<compile_context>
chip_gen: v6e
topology: v6e:2x2x1
jax: 0.10.0
libtpu: 0.0.40
codegen_flags: <defaults>
</compile_context>

<pallas_src>
import jax
import jax.numpy as jnp
from jax import lax
from jax.experimental import pallas as pl
from jax.experimental.pallas import tpu as pltpu


def _linear_kernel(x_ref, w_ref, b_ref, o_ref):
    # x_ref: [TN, C]  VMEM row tile of the input
    # w_ref: [K, C]   VMEM, grid-invariant (PyTorch [out, in] layout, lane-dense on C)
    # b_ref: [K, 1]   VMEM, grid-invariant
    # o_ref: [K, TN]  VMEM, transposed output tile (lane-dense along TN)
    acc = lax.dot_general(
        w_ref[...], x_ref[...],
        dimension_numbers=(((1,), (1,)), ((), ())),  # contract the C axes -> [K, TN]
        preferred_element_type=jnp.float32,
    )
    o_ref[...] = (acc + b_ref[...]).astype(o_ref.dtype)


def _choose_row_tile(n, tile_n):
    """Pick a row-tile size tn (static Python int).

    - n <= 1024: one full-array block (block dims == array dims, so the
      (8,128) divisibility constraint does not apply).
    - otherwise: tn is a multiple of 128 (lane-dense [K, tn] output block),
      capped at tile_n, floored at 1024 rows, and sized so the grid has
      roughly >= 8 steps (keeps both v7x TensorCores fed).
    """
    if n <= 1024:
        return n
    tile_n = max(128, (tile_n // 128) * 128)
    target = -(-n // 8)                      # aim for ~8 grid steps
    tn = -(-target // 128) * 128             # round up to a lane multiple
    return max(1024, min(tile_n, tn))


def classifier_1fc_forward(x, weight, bias, droprate=0.0, tile_n=8192):
    """Pallas implementation of Classifier_1fc.forward.

    x:      [N, C] float32
    weight: [K, C] float32  (PyTorch nn.Linear convention: [out_features, in_features])
    bias:   [K]    float32
    """
    # droprate=0.0 in the reference config => dropout branch is skipped.
    # TODO(synk): dropout (droprate != 0.0, training mode) not implemented in-kernel.
    assert droprate == 0.0, "dropout path not implemented"

    N, C = x.shape
    K, Cw = weight.shape
    assert Cw == C, "weight feature dim must match x"

    tn = _choose_row_tile(N, tile_n)
    grid = (pl.cdiv(N, tn),)

    b2 = bias.reshape(K, 1)

    cost = pl.CostEstimate(
        flops=2 * N * C * K,
        transcendentals=0,
        bytes_accessed=4 * (N * C + K * C + K + N * K),
    )

    out_t = pl.pallas_call(
        _linear_kernel,
        out_shape=jax.ShapeDtypeStruct((K, N), x.dtype),
        grid_spec=pl.GridSpec(
            grid=grid,
            in_specs=[
                pl.BlockSpec((tn, C), lambda i: (i, 0)),   # x row tile
                pl.BlockSpec((K, C), lambda i: (0, 0)),    # W, grid-invariant
                pl.BlockSpec((K, 1), lambda i: (0, 0)),    # bias, grid-invariant
            ],
            out_specs=pl.BlockSpec((K, tn), lambda i: (0, i)),  # lane-dense output
        ),
        compiler_params=pltpu.CompilerParams(
            # Row tiles are independent -> v7x can split them across its 2 TCs.
            dimension_semantics=("parallel",),
        ),
        cost_estimate=cost,
    )(x, weight, b2)

    # Kernel produces [K, N]; restore the module's [N, K] contract.
    return out_t.T


if __name__ == "__main__":
    key = jax.random.PRNGKey(0)
    kx, kw, kb, kx2 = jax.random.split(key, 4)

    # Small shapes consistent with the module: a bag of N=8 instances with
    # n_channels=32 features, classified into n_classes=2.
    N, C, K = 8, 32, 2
    x = jax.random.normal(kx, (N, C), dtype=jnp.float32)
    # Deterministic "nn.Linear"-style parameter init (uniform in +-1/sqrt(C)).
    bound = 1.0 / (C ** 0.5)
    weight = jax.random.uniform(kw, (K, C), minval=-bound, maxval=bound,
                                dtype=jnp.float32)
    bias = jax.random.uniform(kb, (K,), minval=-bound, maxval=bound,
                              dtype=jnp.float32)

    out = classifier_1fc_forward(x, weight, bias, droprate=0.0)
    out = jax.block_until_ready(out)
    ref = x @ weight.T + bias
    assert out.shape == (N, K)
    assert jnp.allclose(out, ref, atol=1e-5, rtol=1e-5)

    # Second check: a larger, non-tile-aligned bag size to exercise the
    # row-tiled path (grid > 1 with a ragged, masked last block).
    N2 = 2500
    x2 = jax.random.normal(kx2, (N2, C), dtype=jnp.float32)
    out2 = classifier_1fc_forward(x2, weight, bias, droprate=0.0)
    out2 = jax.block_until_ready(out2)
    ref2 = x2 @ weight.T + bias
    assert out2.shape == (N2, K)
    assert jnp.allclose(out2, ref2, atol=1e-5, rtol=1e-5)

    print("KERNEL_OK")
</pallas_src>

<mosaic_0001>
module attributes {stable_mosaic.version = 11 : i64} {
  func.func @_linear_kernel(%arg0: i32, %arg1: memref<8x32xf32, #tpu.memory_space<vmem>>, %arg2: memref<2x32xf32, #tpu.memory_space<vmem>>, %arg3: memref<2x1xf32, #tpu.memory_space<vmem>>, %arg4: memref<2x8xf32, #tpu.memory_space<vmem>>) attributes {dimension_semantics = [#tpu.dimension_semantics<parallel>], iteration_bounds = array<i64: 1>, scalar_prefetch = 0 : i64, scratch_operands = 0 : i64, tpu.core_type = #tpu.core_type<tc>, window_params = [{transform_indices = @transform_0, window_bounds = array<i64: 8, 32>}, {pipeline_mode = #tpu.pipeline_mode<synchronous>, transform_indices = @transform_1, window_bounds = array<i64: 2, 32>}, {pipeline_mode = #tpu.pipeline_mode<synchronous>, transform_indices = @transform_2, window_bounds = array<i64: 2, 1>}, {transform_indices = @transform_3, window_bounds = array<i64: 2, 8>}]} {
    %c0 = arith.constant 0 : index
    %c0_0 = arith.constant 0 : index
    %0 = vector.load %arg2[%c0, %c0_0] : memref<2x32xf32, #tpu.memory_space<vmem>>, vector<2x32xf32>
    %c0_1 = arith.constant 0 : index
    %c0_2 = arith.constant 0 : index
    %1 = vector.load %arg1[%c0_1, %c0_2] : memref<8x32xf32, #tpu.memory_space<vmem>>, vector<8x32xf32>
    %cst = arith.constant dense<0.000000e+00> : vector<2x8xf32>
    %2 = tpu.matmul %0, %1, %cst {dimension_numbers = #tpu.dot_dimension_numbers<[1], [1], [0], [0], [0, 0, 1, 0], [], []>} : vector<2x32xf32>, vector<8x32xf32>, vector<2x8xf32> -> vector<2x8xf32>
    %c0_3 = arith.constant 0 : index
    %c0_4 = arith.constant 0 : index
    %3 = vector.load %arg3[%c0_3, %c0_4] : memref<2x1xf32, #tpu.memory_space<vmem>>, vector<2x1xf32>
    %4 = vector.broadcast %3 : vector<2x1xf32> to vector<2x8xf32>
    %5 = arith.addf %2, %4 : vector<2x8xf32>
    %c0_5 = arith.constant 0 : index
    %c0_6 = arith.constant 0 : index
    %6 = vector.load %arg4[%c0_5, %c0_6] : memref<2x8xf32, #tpu.memory_space<vmem>>, vector<2x8xf32>
    tpu.vector_store %arg4[%c0_5, %c0_6], %5 {strides = array<i32>} : memref<2x8xf32, #tpu.memory_space<vmem>>, vector<2x8xf32>,
    return
  }
  func.func @transform_0(%arg0: i32) -> (i32, i32) {
    %c0_i32 = arith.constant 0 : i32
    %c0_i32_0 = arith.constant 0 : i32
    return %arg0, %c0_i32 : i32, i32
  }
  func.func @transform_1(%arg0: i32) -> (i32, i32) {
    %c0_i32 = arith.constant 0 : i32
    %c0_i32_0 = arith.constant 0 : i32
    %c0_i32_1 = arith.constant 0 : i32
    return %c0_i32, %c0_i32_0 : i32, i32
  }
  func.func @transform_2(%arg0: i32) -> (i32, i32) {
    %c0_i32 = arith.constant 0 : i32
    %c0_i32_0 = arith.constant 0 : i32
    %c0_i32_1 = arith.constant 0 : i32
    return %c0_i32, %c0_i32_0 : i32, i32
  }
  func.func @transform_3(%arg0: i32) -> (i32, i32) {
    %c0_i32 = arith.constant 0 : i32
    %c0_i32_0 = arith.constant 0 : i32
    return %c0_i32, %arg0 : i32, i32
  }
}

</mosaic_0001>

<bundles_post_ra>
// kernel: tpu_custom_call.1
= control target key start
LH: loop header
LB: loop body
LE: loop exit
PB: predicated region body
PF: predicated region fallthrough
CT: control target
= control target key end

     0   :  { %8 = vsyncpa [#allocation3], 0  ;;  %s225_s0 = inlined_call_operand.hbm [shape: f32[8,32], index: 0, kind: input, shape index: {}]   ;;  %s226_s1 = inlined_call_operand.vmem [shape: f32[2,32], index: 1, kind: input, shape index: {}]   ;;  %s227_s2 = inlined_call_operand.vmem [shape: f32[2,1], index: 2, kind: input, shape index: {}]   ;;  %s228_s3 = inlined_call_operand.hbm [shape: f32[2,8], index: 3, kind: output, shape index: {}]  }
   0x1   :  { %9 = vsyncpa [#allocation4], 0  ;;  %s188_s12 = smov [#allocation2]  }
   0x2   :  { %s16_s13 = sshll.u32 %s188_s12, 4  ;;  %s17_s13 = int_to_ptr.vmem [resolvable:$true] %s16_s13 }
   0x3   :  { %s152_s14 = scalar_lea.vmem %s17_s13, 128  ;;  %p157_p1 = scmp.lt.s32.totalorder %s17_s13, %s17_s13 }
   0x4   :  { %p153_p0 = scmp.ne.s32.totalorder %s17_s13, %s152_s14  ;;  %p158_p2 = scmp.lt.s32.totalorder %s152_s14, %s152_s14 }
   0x6   :  { %p159_p3 = por %p158_p2, %p157_p1 }
   0x8   :  { %p160_p4 = pnand %p159_p3, %p153_p0 }
   0xa   :  { %163 = shalt.err (!%p160_p4)
}
   0xb   :  { %19 = dma.hbm_to_vmem [thread:$0]  %s225_s0, 128, %s17_s13, [#allocation3]  }
   0xc   :  { %184 = dma.done.wait [#allocation3], 128  }
   0xd   :  { %185 = vsyncadd [#allocation3], 4294967168  ;;  %v189_v0 = vmov 0.0   ;;  %vm190_vm0 = vmmov 0   ;;  %v191_v1 = vmov 0   ;;  %vm35_vm1 = vcmask 261120  }
   0xe   :  { %133 = vmatprep.subr.mxu0 %v189_v0  ;;  %135 = vmatprep.mubr.msk.f32.mxu0 %vm190_vm0, %v189_v0  ;;  %v28_v2 = vld [vmem:[#allocation2] sm:$0xff]  ;;  %s192_s0 = smov [#allocation5]   ;;  %vm112_vm2 = vcmask 58368  }
   0xf   :  { %143 = vset.pattern.permute.xlu0 %v191_v1  ;;  %v29_v3 = vld [vmem:[%s227_s2] sm:$0x3]  ;;  %134 = vmatpush3.xpose.msk.msra.mxu0 %vm35_vm1, %v28_v2  ;;  %s120_s21 = sshll.u32 %s192_s0, 4  ;;  %s121_s21 = int_to_ptr.vmem [resolvable:$true] %s120_s21 }
  0x10   :  { %v27_v4 = vld [vmem:[%s226_s1] sm:$0x3]  ;;  %32 = vperm.xlu0 %143, %v29_v3   ;;  %s164_s22 = scalar_lea.vmem %s121_s21, 32  ;;  %p169_p6 = scmp.lt.s32.totalorder %s121_s21, %s121_s21 }
  0x11   :  { %p165_p5 = scmp.ne.s32.totalorder %s121_s21, %s164_s22  ;;  %p170_p7 = scmp.lt.s32.totalorder %s164_s22, %s164_s22 }
  0x12   :  { %136 = vmatmul.mubr.msk.f32.vlgmr.msra.gmra.mxu0 %vm35_vm1, %v27_v4 }
  0x13   :  { %p171_p8 = por %p170_p7, %p169_p6 }
  0x15   :  { %p172_p9 = pnand %p171_p8, %p165_p5 }
  0x8b   :  { %v33_v5 = vpop.permute.xlu0 %32 }
  0xd2   :  { %v108_v6 = vpop.f32.mrf.mxu0 }
  0xd3   :  { %v109_v7 = vadd.f32 %v108_v6, %v33_v5 }
  0xd4   :  { %v137_v8 = vpop.f32.mrf.mxu0 }
  0xd5   :  { %113 = vst.msk [vmem:[#allocation5] sm:$0x3] %vm112_vm2, %v109_v7 }
  0xd6   :  { %175 = shalt.err (!%p172_p9)
}
  0xd7   :  { %123 = dma.vmem_to_hbm [thread:$0]  %s121_s21, 32, %s228_s3, [#allocation4]  }
  0xd8   :  { %186 = dma.done.wait [#allocation4], 32  }
  0xd9   :  { %187 = vsyncadd [#allocation4], 4294967264 }
  0xda   :  { %127 = vsyncpa [#allocation3], 1 }
  0xdb   :  { %128 = vsyncpa [#allocation4], 1 }

</bundles_post_ra>
